<compile_context>
chip_gen: v6e
topology: v6e:2x2x1
jax: 0.10.0
libtpu: 0.0.40
codegen_flags: <defaults>
</compile_context>

<pallas_src>
import functools

import jax
import jax.numpy as jnp
from jax.experimental import pallas as pl
from jax.experimental.pallas import tpu as pltpu


def pvdbow_loss_kernel(q_ref, sumhw_ref, rt_ref, out_ref, m_ref, s_ref, *,
                       D, TD, M, inv_T, half_alpha):
    """q_ref: (1, dim) f32      sumhw_ref: (1, 1) f32 (= sum_t h[w_t])
    rt_ref: (dim, TD) streamed vocab tile (bf16 or f32)
    out_ref: (1, 1) f32 loss    m_ref / s_ref: (1, 1) f32 VMEM scratch (online logsumexp)."""
    k = pl.program_id(0)

    @pl.when(k == 0)
    def _init():
        m_ref[...] = jnp.full_like(m_ref, -jnp.inf)   # running max
        s_ref[...] = jnp.zeros_like(s_ref)            # running sum of exp

    # --- streamed matvec slice on the MXU: h = q @ Rt[:, k*TD : (k+1)*TD] ---
    qv = q_ref[...].astype(rt_ref.dtype)                                  # (1, dim)
    h = jnp.dot(qv, rt_ref[...], preferred_element_type=jnp.float32)      # (1, TD) f32

    # --- mask lanes beyond the true vocab size (partial last tile) ---
    col = jax.lax.broadcasted_iota(jnp.int32, h.shape, 1) + k * TD
    h = jnp.where(col < D, h, -jnp.inf)

    # --- online (flash-style) logsumexp update ---
    m_old = m_ref[...]                                                    # (1, 1)
    s_old = s_ref[...]                                                    # (1, 1)
    m_new = jnp.maximum(m_old, jnp.max(h, axis=1, keepdims=True))
    s_new = s_old * jnp.exp(m_old - m_new) + jnp.sum(jnp.exp(h - m_new),
                                                     axis=1, keepdims=True)
    m_ref[...] = m_new
    s_ref[...] = s_new

    # --- finalize the scalar loss on the last vocab tile ---
    @pl.when(k == pl.num_programs(0) - 1)
    def _fini():
        logZ = m_ref[...] + jnp.log(s_ref[...])                           # (1, 1)
        q32 = q_ref[...]
        qsq = jnp.sum(q32 * q32, keepdims=True)                           # (1, 1)
        obj = jnp.float32(M) * logZ - sumhw_ref[...]                      # sum_t psi_t
        out_ref[...] = inv_T * obj + half_alpha * qsq


def prepare_weights(R, weights_dtype=jnp.bfloat16):
    """One-time prep of the word-embedding matrix (cache it across inference steps:
    R is a fixed parameter).  Transposes so the vocab axis D is lane-dense and casts
    to bf16 so the kernel's HBM stream moves half the bytes.  R: (D, dim) -> (dim, D)."""
    return jnp.asarray(R, jnp.float32).astype(weights_dtype).T


def paragraph_vector_inference_forward(q, Rt, orig, *, context_size=5, alpha=1e-4,
                                       tile_d=8192):
    """q: (dim,) f32 paragraph vector, Rt: (dim, D) prepared weights (prepare_weights),
    orig: (T,) int32 encoded doc.  Returns scalar PVDBOW / mode='true' loss.

    tile_d: vocab tile width; size it per generation (keep ~3 buffers * dim * tile_d *
    itemsize well under the scoped VMEM budget: 32 MiB default on v6e/v7x, 16 MiB v5e)."""
    dim, D = int(Rt.shape[0]), int(Rt.shape[1])
    T = int(orig.shape[0])
    M = T - 2 * context_size
    assert M > 0, "document shorter than 2*context_size + 1"
    assert tile_d % 128 == 0

    q32 = jnp.asarray(q, jnp.float32)
    q_row = q32.reshape(1, dim)
    # same rounding of q as the in-kernel MXU dot uses (bf16 weight streaming)
    q_round = q32.astype(Rt.dtype).astype(jnp.float32)

    # sum_t h[w_t] = q . (sum_t R[w_t, :])  -- O(M*dim) gather+sum, no (M, D) one-hot.
    # NOTE: PyTorch would raise on center ids >= D; ids are assumed in-range here.
    center = orig[context_size:T - context_size].astype(jnp.int32)
    r_sum = jnp.sum(Rt[:, center].astype(jnp.float32), axis=1)            # (dim,)
    sum_h_w = jnp.dot(q_round, r_sum).reshape(1, 1)                       # (1, 1) f32

    TD = D if D <= tile_d else tile_d
    num_tiles = pl.cdiv(D, TD)

    rt_spec_kwargs = {}
    if num_tiles >= 3:
        # deeper pipelining for the pure HBM stream of vocab tiles
        rt_spec_kwargs["pipeline_mode"] = pl.Buffered(3)
    rt_spec = pl.BlockSpec((dim, TD), lambda k: (0, k), **rt_spec_kwargs)

    kernel = functools.partial(pvdbow_loss_kernel, D=D, TD=TD, M=M,
                               inv_T=1.0 / T, half_alpha=0.5 * alpha)

    itemsize = jnp.dtype(Rt.dtype).itemsize
    out = pl.pallas_call(
        kernel,
        out_shape=jax.ShapeDtypeStruct((1, 1), jnp.float32),
        grid_spec=pltpu.PrefetchScalarGridSpec(
            num_scalar_prefetch=0,
            grid=(num_tiles,),
            in_specs=[
                pl.BlockSpec((1, dim), lambda k: (0, 0)),   # q row (resident)
                pl.BlockSpec((1, 1), lambda k: (0, 0)),     # sum_t h[w_t] (resident)
                rt_spec,                                     # streamed vocab tiles
            ],
            out_specs=pl.BlockSpec((1, 1), lambda k: (0, 0)),
            scratch_shapes=[pltpu.VMEM((1, 1), jnp.float32),   # running max
                            pltpu.VMEM((1, 1), jnp.float32)],  # running sum-exp
        ),
        compiler_params=pltpu.CompilerParams(
            dimension_semantics=("arbitrary",)),  # vocab axis is a reduction
        cost_estimate=pl.CostEstimate(
            flops=2 * dim * D + 4 * D,
            transcendentals=D,
            bytes_accessed=int(dim * D * itemsize + (dim + 2) * 4)),
    )(q_row, sum_h_w, Rt)
    return out[0, 0]


def reference_forward(q, R, orig, *, context_size=5, alpha=1e-4, weights_dtype=None):
    """Pure-JAX port of the PyTorch forward (PVDBOW, mode='true').  If weights_dtype
    is given, R and q are rounded to it (mirroring the kernel's bf16 streaming) but
    all arithmetic stays f32."""
    T = orig.shape[0]
    q32 = jnp.asarray(q, jnp.float32)
    R32 = jnp.asarray(R, jnp.float32)
    qh = q32
    if weights_dtype is not None:
        R32 = R32.astype(weights_dtype).astype(jnp.float32)
        qh = q32.astype(weights_dtype).astype(jnp.float32)
    h = R32 @ qh                                              # (D,)
    log_sm = jax.nn.log_softmax(h)
    center = orig[context_size:T - context_size]
    psi = -log_sm[center]
    return psi.sum() / T + 0.5 * alpha * jnp.sum(q32 * q32)


if __name__ == "__main__":
    key = jax.random.PRNGKey(0)
    k_r, k_q, k_doc, k_r2, k_q2, k_doc2 = jax.random.split(key, 6)
    cs, alpha = 5, 1e-4

    # --- case 1: module-scale toy sizes, single vocab tile ---
    D, dim, T = 256, 32, 18
    R = jax.random.normal(k_r, (D, dim), dtype=jnp.float32) * 0.1
    q = jax.random.normal(k_q, (dim,), dtype=jnp.float32) * 0.1
    orig = jax.random.randint(k_doc, (T,), 0, D, dtype=jnp.int32)

    Rt = prepare_weights(R)   # transpose + bf16 cast once; reused across SGD steps in infer()
    loss = paragraph_vector_inference_forward(q, Rt, orig, context_size=cs, alpha=alpha)
    loss = jax.block_until_ready(loss)

    ref_bf = reference_forward(q, R, orig, context_size=cs, alpha=alpha,
                               weights_dtype=jnp.bfloat16)
    ref_fp = reference_forward(q, R, orig, context_size=cs, alpha=alpha)
    assert jnp.allclose(loss, ref_bf, rtol=2e-4, atol=1e-4), (loss, ref_bf)
    assert jnp.allclose(loss, ref_fp, rtol=2e-2, atol=2e-2), (loss, ref_fp)

    # --- case 2: forces the tiled streaming path (grid=3, Buffered(3), partial last tile) ---
    D2, dim2, T2 = 300, 32, 24
    R2 = jax.random.normal(k_r2, (D2, dim2), dtype=jnp.float32) * 0.1
    q2 = jax.random.normal(k_q2, (dim2,), dtype=jnp.float32) * 0.1
    orig2 = jax.random.randint(k_doc2, (T2,), 0, D2, dtype=jnp.int32)

    Rt2 = prepare_weights(R2)
    loss2 = paragraph_vector_inference_forward(q2, Rt2, orig2, context_size=cs, alpha=alpha,
                                               tile_d=128)
    loss2 = jax.block_until_ready(loss2)

    ref2_bf = reference_forward(q2, R2, orig2, context_size=cs, alpha=alpha,
                                weights_dtype=jnp.bfloat16)
    ref2_fp = reference_forward(q2, R2, orig2, context_size=cs, alpha=alpha)
    assert jnp.allclose(loss2, ref2_bf, rtol=2e-4, atol=1e-4), (loss2, ref2_bf)
    assert jnp.allclose(loss2, ref2_fp, rtol=2e-2, atol=2e-2), (loss2, ref2_fp)

    print("KERNEL_OK")
</pallas_src>

<mosaic_0001>
module attributes {stable_mosaic.version = 11 : i64} {
  func.func @pvdbow_loss_kernel(%arg0: i32, %arg1: memref<1x32xf32, #tpu.memory_space<vmem>>, %arg2: memref<1x1xf32, #tpu.memory_space<vmem>>, %arg3: memref<32x256xbf16, #tpu.memory_space<vmem>>, %arg4: memref<1x1xf32, #tpu.memory_space<vmem>>, %arg5: memref<1x1xf32, #tpu.memory_space<vmem>>, %arg6: memref<1x1xf32, #tpu.memory_space<vmem>>) attributes {dimension_semantics = [#tpu.dimension_semantics<arbitrary>], iteration_bounds = array<i64: 1>, scalar_prefetch = 0 : i64, scratch_operands = 2 : i64, tpu.core_type = #tpu.core_type<tc>, window_params = [{pipeline_mode = #tpu.pipeline_mode<synchronous>, transform_indices = @transform_0, window_bounds = array<i64: 1, 32>}, {pipeline_mode = #tpu.pipeline_mode<synchronous>, transform_indices = @transform_1, window_bounds = array<i64: 1, 1>}, {transform_indices = @transform_2, window_bounds = array<i64: 32, 256>}, {pipeline_mode = #tpu.pipeline_mode<synchronous>, transform_indices = @transform_3, window_bounds = array<i64: 1, 1>}]} {
    %c0_i32 = arith.constant 0 : i32
    %0 = arith.cmpi eq, %arg0, %c0_i32 : i32
    %1 = arith.extui %0 : i1 to i32
    %c0_i32_0 = arith.constant 0 : i32
    %2 = arith.cmpi ne, %1, %c0_i32_0 : i32
    scf.if %2 {
      %cst_18 = arith.constant 0xFF800000 : f32
      %34 = vector.broadcast %cst_18 : f32 to vector<1x1xf32>
      %c0_19 = arith.constant 0 : index
      %c0_20 = arith.constant 0 : index
      %35 = vector.load %arg5[%c0_19, %c0_20] : memref<1x1xf32, #tpu.memory_space<vmem>>, vector<1x1xf32>
      tpu.vector_store %arg5[%c0_19, %c0_20], %34 {strides = array<i32>} : memref<1x1xf32, #tpu.memory_space<vmem>>, vector<1x1xf32>,
      %cst_21 = arith.constant 0.000000e+00 : f32
      %36 = vector.broadcast %cst_21 : f32 to vector<1x1xf32>
      %c0_22 = arith.constant 0 : index
      %c0_23 = arith.constant 0 : index
      %37 = vector.load %arg6[%c0_22, %c0_23] : memref<1x1xf32, #tpu.memory_space<vmem>>, vector<1x1xf32>
      tpu.vector_store %arg6[%c0_22, %c0_23], %36 {strides = array<i32>} : memref<1x1xf32, #tpu.memory_space<vmem>>, vector<1x1xf32>,
    } else {
    }
    %c0 = arith.constant 0 : index
    %c0_1 = arith.constant 0 : index
    %3 = vector.load %arg1[%c0, %c0_1] : memref<1x32xf32, #tpu.memory_space<vmem>>, vector<1x32xf32>
    %4 = arith.truncf %3 : vector<1x32xf32> to vector<1x32xbf16>
    %c0_2 = arith.constant 0 : index
    %c0_3 = arith.constant 0 : index
    %5 = vector.load %arg3[%c0_2, %c0_3] : memref<32x256xbf16, #tpu.memory_space<vmem>>, vector<32x256xbf16>
    %cst = arith.constant dense<0.000000e+00> : vector<1x256xf32>
    %6 = tpu.matmul %4, %5, %cst {dimension_numbers = #tpu.dot_dimension_numbers<[1], [0], [0], [1], [0, 0, 1, 1], [], []>} : vector<1x32xbf16>, vector<32x256xbf16>, vector<1x256xf32> -> vector<1x256xf32>
    %7 = tpu.iota {dimensions = array<i32: 1>} : vector<1x256xi32>
    %c256_i32 = arith.constant 256 : i32
    %8 = arith.muli %arg0, %c256_i32 : i32
    %9 = vector.broadcast %8 : i32 to vector<1x256xi32>
    %10 = arith.addi %7, %9 : vector<1x256xi32>
    %c256_i32_4 = arith.constant 256 : i32
    %11 = vector.broadcast %c256_i32_4 : i32 to vector<1x256xi32>
    %12 = arith.cmpi slt, %10, %11 : vector<1x256xi32>
    %cst_5 = arith.constant 0xFF800000 : f32
    %13 = vector.broadcast %cst_5 : f32 to vector<1x256xf32>
    %14 = arith.select %12, %6, %13 : vector<1x256xi1>, vector<1x256xf32>
    %c0_6 = arith.constant 0 : index
    %c0_7 = arith.constant 0 : index
    %15 = vector.load %arg5[%c0_6, %c0_7] : memref<1x1xf32, #tpu.memory_space<vmem>>, vector<1x1xf32>
    %c0_8 = arith.constant 0 : index
    %c0_9 = arith.constant 0 : index
    %16 = vector.load %arg6[%c0_8, %c0_9] : memref<1x1xf32, #tpu.memory_space<vmem>>, vector<1x1xf32>
    %cst_10 = arith.constant dense<0xFF800000> : vector<1xf32>
    %17 = vector.multi_reduction <maximumf>, %14, %cst_10 [1] : vector<1x256xf32> to vector<1xf32>
    %18 = vector.shape_cast %17 : vector<1xf32> to vector<1x1xf32>
    %19 = arith.maximumf %15, %18 : vector<1x1xf32>
    %20 = arith.subf %15, %19 : vector<1x1xf32>
    %21 = math.exp %20 : vector<1x1xf32>
    %22 = arith.mulf %16, %21 : vector<1x1xf32>
    %23 = vector.broadcast %19 : vector<1x1xf32> to vector<1x256xf32>
    %24 = arith.subf %14, %23 : vector<1x256xf32>
    %25 = math.exp %24 : vector<1x256xf32>
    %cst_11 = arith.constant dense<0.000000e+00> : vector<1xf32>
    %26 = vector.multi_reduction <add>, %25, %cst_11 [1] : vector<1x256xf32> to vector<1xf32>
    %27 = vector.shape_cast %26 : vector<1xf32> to vector<1x1xf32>
    %28 = arith.addf %22, %27 : vector<1x1xf32>
    %c0_12 = arith.constant 0 : index
    %c0_13 = arith.constant 0 : index
    %29 = vector.load %arg5[%c0_12, %c0_13] : memref<1x1xf32, #tpu.memory_space<vmem>>, vector<1x1xf32>
    tpu.vector_store %arg5[%c0_12, %c0_13], %19 {strides = array<i32>} : memref<1x1xf32, #tpu.memory_space<vmem>>, vector<1x1xf32>,
    %c0_14 = arith.constant 0 : index
    %c0_15 = arith.constant 0 : index
    %30 = vector.load %arg6[%c0_14, %c0_15] : memref<1x1xf32, #tpu.memory_space<vmem>>, vector<1x1xf32>
    tpu.vector_store %arg6[%c0_14, %c0_15], %28 {strides = array<i32>} : memref<1x1xf32, #tpu.memory_space<vmem>>, vector<1x1xf32>,
    %c0_i32_16 = arith.constant 0 : i32
    %31 = arith.cmpi eq, %arg0, %c0_i32_16 : i32
    %32 = arith.extui %31 : i1 to i32
    %c0_i32_17 = arith.constant 0 : i32
    %33 = arith.cmpi ne, %32, %c0_i32_17 : i32
    scf.if %33 {
      %c0_18 = arith.constant 0 : index
      %c0_19 = arith.constant 0 : index
      %34 = vector.load %arg5[%c0_18, %c0_19] : memref<1x1xf32, #tpu.memory_space<vmem>>, vector<1x1xf32>
      %c0_20 = arith.constant 0 : index
      %c0_21 = arith.constant 0 : index
      %35 = vector.load %arg6[%c0_20, %c0_21] : memref<1x1xf32, #tpu.memory_space<vmem>>, vector<1x1xf32>
      %36 = math.log %35 : vector<1x1xf32>
      %37 = arith.addf %34, %36 : vector<1x1xf32>
      %c0_22 = arith.constant 0 : index
      %c0_23 = arith.constant 0 : index
      %38 = vector.load %arg1[%c0_22, %c0_23] : memref<1x32xf32, #tpu.memory_space<vmem>>, vector<1x32xf32>
      %39 = arith.mulf %38, %38 : vector<1x32xf32>
      %40 = vector.shape_cast %39 : vector<1x32xf32> to vector<1x1x32xf32>
      %cst_24 = arith.constant dense<0.000000e+00> : vector<1xf32>
      %41 = vector.multi_reduction <add>, %40, %cst_24 [1, 2] : vector<1x1x32xf32> to vector<1xf32>
      %42 = vector.shape_cast %41 : vector<1xf32> to vector<1x1x1xf32>
      %43 = vector.extract %42[0, 0, 0] : f32 from vector<1x1x1xf32>
      %44 = vector.broadcast %43 : f32 to vector<1x1xf32>
      %cst_25 = arith.constant 8.000000e+00 : f32
      %45 = vector.broadcast %cst_25 : f32 to vector<1x1xf32>
      %46 = arith.mulf %45, %37 : vector<1x1xf32>
      %c0_26 = arith.constant 0 : index
      %c0_27 = arith.constant 0 : index
      %47 = vector.load %arg2[%c0_26, %c0_27] : memref<1x1xf32, #tpu.memory_space<vmem>>, vector<1x1xf32>
      %48 = arith.subf %46, %47 : vector<1x1xf32>
      %cst_28 = arith.constant 0.055555556 : f32
      %49 = vector.broadcast %cst_28 : f32 to vector<1x1xf32>
      %50 = arith.mulf %49, %48 : vector<1x1xf32>
      %cst_29 = arith.constant 5.000000e-05 : f32
      %51 = vector.broadcast %cst_29 : f32 to vector<1x1xf32>
      %52 = arith.mulf %51, %44 : vector<1x1xf32>
      %53 = arith.addf %50, %52 : vector<1x1xf32>
      %c0_30 = arith.constant 0 : index
      %c0_31 = arith.constant 0 : index
      %54 = vector.load %arg4[%c0_30, %c0_31] : memref<1x1xf32, #tpu.memory_space<vmem>>, vector<1x1xf32>
      tpu.vector_store %arg4[%c0_30, %c0_31], %53 {strides = array<i32>} : memref<1x1xf32, #tpu.memory_space<vmem>>, vector<1x1xf32>,
    } else {
    }
    return
  }
  func.func @transform_0(%arg0: i32) -> (i32, i32) {
    %c0_i32 = arith.constant 0 : i32
    %c0_i32_0 = arith.constant 0 : i32
    %c0_i32_1 = arith.constant 0 : i32
    return %c0_i32, %c0_i32_0 : i32, i32
  }
  func.func @transform_1(%arg0: i32) -> (i32, i32) {
    %c0_i32 = arith.constant 0 : i32
    %c0_i32_0 = arith.constant 0 : i32
    %c0_i32_1 = arith.constant 0 : i32
    return %c0_i32, %c0_i32_0 : i32, i32
  }
  func.func @transform_2(%arg0: i32) -> (i32, i32) {
    %c0_i32 = arith.constant 0 : i32
    %c0_i32_0 = arith.constant 0 : i32
    return %c0_i32, %arg0 : i32, i32
  }
  func.func @transform_3(%arg0: i32) -> (i32, i32) {
    %c0_i32 = arith.constant 0 : i32
    %c0_i32_0 = arith.constant 0 : i32
    %c0_i32_1 = arith.constant 0 : i32
    return %c0_i32, %c0_i32_0 : i32, i32
  }
}

</mosaic_0001>

<bundles_post_ra>
// kernel: tpu_custom_call.1
= control target key start
LH: loop header
LB: loop body
LE: loop exit
PB: predicated region body
PF: predicated region fallthrough
CT: control target
= control target key end

     0   :  { %s326_s0 = inlined_call_operand.vmem [shape: f32[1,32], index: 0, kind: input, shape index: {}]   ;;  %s327_s1 = inlined_call_operand.<no memory space> [shape: f32[1,1], index: 1, kind: input, shape index: {}]   ;;  %s328_s2 = inlined_call_operand.hbm [shape: bf16[32,256], index: 2, kind: input, shape index: {}]   ;;  %s329_s3 = inlined_call_operand.hbm [shape: f32[1,1], index: 3, kind: output, shape index: {}]  }
   0x1   :  { %v8_v0 = vstv %s327_s1 }
   0x2   :  { %9 = vst [vmem:[#allocation4] sm:$0x1] %v8_v0 }
   0x3   :  { %10 = vsyncpa [#allocation6], 0 }
   0x4   :  { %11 = vsyncpa [#allocation7], 0  ;;  %s275_s14 = smov [#allocation5]  }
   0x5   :  { %s21_s15 = sshll.u32 %s275_s14, 4  ;;  %s22_s15 = int_to_ptr.vmem [resolvable:$true] %s21_s15 }
   0x6   :  { %s239_s16 = scalar_lea.vmem %s22_s15, 512  ;;  %p244_p1 = scmp.lt.s32.totalorder %s22_s15, %s22_s15 }
   0x7   :  { %p240_p0 = scmp.ne.s32.totalorder %s22_s15, %s239_s16  ;;  %p245_p2 = scmp.lt.s32.totalorder %s239_s16, %s239_s16 }
   0x9   :  { %p246_p3 = por %p245_p2, %p244_p1 }
   0xb   :  { %p247_p4 = pnand %p246_p3, %p240_p0 }
   0xd   :  { %250 = shalt.err (!%p247_p4)
}
   0xe   :  { %s276_s17 = smov 128   ;;  %s277_s18 = smov 8  }
   0xf   :  { %27 = dma.hbm_to_vmem [thread:$0]  %s328_s2, 512, %s22_s15, [#allocation6], %s276_s17, %s276_s17, %s277_s18  }
  0x10   :  { %271 = dma.done.wait [#allocation6], 512  }
  0x11   :  { %272 = vsyncadd [#allocation6], 4294966784  ;;  %v278_v1 = vmov 0   ;;  %v217_v2 = vld [vmem:[#allocation5 + $0x14] ss:$8 sps:$4 sm:$0xff]   ;;  %vm65_vm0 = vcmask 261120   ;;  %v139_v31 = vlaneseq }
  0x12   :  { %101 = vmatprep.mubr.bf16.mxu0 %v278_v1  ;;  %216 = vset.pattern.permute.xlu0 %v278_v1  ;;  %v219_v3 = vld [vmem:[#allocation5 + $0x10] ss:$8 sps:$4 sm:$0xff]   ;;  %v220_v4 = vld [vmem:[#allocation5 + $0x4] ss:$8 sps:$4 sm:$0xff]   ;;  %v222_v5 = vld [vmem:[#allocation5] ss:$8 sps:$4 sm:$0xff]  }
  0x13   :  { %81 = vmatprep.subr.bf16.mxu0 %v217_v2  ;;  %v39_v6 = vld [vmem:[%s326_s0] sm:$0x1]  ;;  %vm36_vm1 = vcmask 0   ;;  %v279_v8 = vmov -inf   ;;  %vm123_vm2 = vcmask 1040384   ;;  %vm168_vm3 = vcmask 253952  }
  0x14   :  { %82 = vmatpush1.bf16.msra.mxu0 %v219_v3  ;;  %v40_v7 = vpack.c.bf16 %v39_v6, %v39_v6  ;;  %37 = vst.msk [vmem:[#allocation2] sm:$0x1] %vm36_vm1, %v279_v8  ;;  %v166_v16 = vld [vmem:[%s326_s0] sm:$0x1]  ;;  %v280_v19 = vmov 0.0   ;;  %v140_v32 = vshrl.u32 %v139_v31, 7 }
  0x15   :  { %83 = vmatprep.subr.bf16.mxu0 %v220_v4  ;;  %v167_v17 = vmul.f32 %v166_v16, %v166_v16  ;;  %38 = vst.msk [vmem:[#allocation3] sm:$0x1] %vm36_vm1, %v280_v19  ;;  %v181_v56 = vld [vmem:[#allocation4] sm:$0x1]  ;;  %s281_s23 = smov [#allocation8]  }
  0x16   :  { %v141_v33 = vsub.s32 0, %v140_v32  ;;  %s193_s24 = sshll.u32 %s281_s23, 4  ;;  %s194_s24 = int_to_ptr.vmem [resolvable:$true] %s193_s24 }
  0x17   :  { %v169_v18 = vsel %vm168_vm3, %v167_v17, 0.0  ;;  %s251_s25 = scalar_lea.vmem %s194_s24, 16  ;;  %s255_s26 = scalar_lea.vmem %s194_s24, 32 }
  0x18   :  { %84 = vmatpush1.bf16.msra.mxu0 %v222_v5  ;;  %170 = vadd.xlane.f32.xlu1 %v169_v18  ;;  %p252_p5 = scmp.ne.s32.totalorder %s194_s24, %s251_s25  ;;  %p256_p6 = scmp.lt.s32.totalorder %s194_s24, %s194_s24 }
  0x19   :  { %p257_p7 = scmp.lt.s32.totalorder %s255_s26, %s251_s25 }
  0x1b   :  { %206 = vmatmul.mubr.msk.bf16.vlgmr.msra.gmra.mxu0 %vm65_vm0, %v40_v7  ;;  %v121_v20 = vld [vmem:[#allocation2] sm:$0x1]  ;;  %p258_p8 = por %p257_p7, %p256_p6 }
  0x1c   :  { %v122_v47 = vld [vmem:[#allocation3] sm:$0x1] }
  0x1d   :  { %p259_p9 = pnand %p258_p8, %p252_p5 }
  0xa1   :  { %v171_v24 = vpop.xlane.xlu1 %170 }
  0xa2   :  { %v172_v25 = vrot.slane %v171_v24, 4 }
  0xa4   :  { %v173_v26 = vadd.f32 %v172_v25, %v171_v24 }
  0xa6   :  { %v174_v27 = vrot.slane %v173_v26, 2 }
  0xa8   :  { %v175_v28 = vadd.f32 %v174_v27, %v173_v26 }
  0xaa   :  { %v176_v29 = vrot.slane %v175_v28, 1 }
  0xac   :  { %v177_v30 = vadd.f32 %v176_v29, %v175_v28 }
  0xae   :  { %207 = vpush %v177_v30 }
  0xdb   :  { %v103_v9 = vpop.f32.mrf.mxu0 }
  0xdc   :  { %v124_v11 = vsel %vm123_vm2, %v103_v9, -inf }
  0xdd   :  { %v105_v10 = vpop.f32.mrf.mxu0 }
  0xde   :  { %v125_v12 = vsel %vm123_vm2, %v105_v10, -inf }
  0xdf   :  { %v107_v13 = vpop.f32.mrf.mxu0  ;;  %v126_v14 = vmax.f32 %v124_v11, %v125_v12  ;;  %s208_s0 = spop %207 }
  0xe0   :  { %v179_v58 = vstv %s208_s0 }
  0xe1   :  { %127 = vmax.xlane.f32.xlu0 %v126_v14  ;;  %v108_v15 = vpop.f32.mrf.mxu0  ;;  %v184_v61 = vmul.f32 5e-05, %v179_v58 }
 0x16a   :  { %v128_v21 = vpop.xlane.xlu0 %127 }
 0x16b   :  { %v129_v22 = vmax.f32 %v121_v20, %v128_v21 }
 0x16d   :  { %v130_v23 = vsub.f32 %v121_v20, %v129_v22  ;;  %156 = vst.msk [vmem:[#allocation2] sm:$0x1] %vm36_vm1, %v129_v22  ;;  %136 = vperm.xlu0 %216, %v129_v22  }
 0x16f   :  { %v131_v45 = vmul.f32 1.442695, %v130_v23 }
 0x174   :  { %v161_v54 = vld [vmem:[#allocation2] sm:$0x1] }
 0x1e8   :  { %v137_v34 = vpop.permute.xlu0 %136 }
 0x1e9   :  { %v142_v35 = vrot.slane %v137_v34, %v141_v33 }
 0x1eb   :  { %v143_v36 = vsub.f32 %v103_v9, %v142_v35  ;;  %v144_v37 = vsub.f32 %v105_v10, %v142_v35 }
 0x1ed   :  { %v145_v38 = vmul.f32 1.442695, %v143_v36  ;;  %v147_v39 = vmul.f32 1.442695, %v144_v37 }
 0x1ef   :  { %223 = vpow2.f32 %v145_v38 }
 0x1f0   :  { %225 = vpow2.f32 %v147_v39 }
 0x1f1   :  { %227 = vpow2.f32 %v131_v45 }
 0x1fc   :  { %v224_v40 = vpop.eup %223 }
 0x1fd   :  { %v226_v41 = vpop.eup %225  ;;  %v149_v42 = vsel %vm123_vm2, %v224_v40, 0.0 }
 0x1fe   :  { %v150_v43 = vsel %vm123_vm2, %v226_v41, 0.0  ;;  %v228_v46 = vpop.eup %227 }
 0x1ff   :  { %v151_v44 = vadd.f32 %v150_v43, %v149_v42  ;;  %v133_v48 = vmul.f32 %v228_v46, %v122_v47 }
 0x201   :  { %152 = vadd.xlane.f32.xlu1 %v151_v44 }
 0x28a   :  { %v153_v49 = vpop.xlane.xlu1 %152 }
 0x28b   :  { %v154_v50 = vadd.f32 %v153_v49, %v133_v48 }
 0x28d   :  { %157 = vst.msk [vmem:[#allocation3] sm:$0x1] %vm36_vm1, %v154_v50 }
 0x294   :  { %v162_v51 = vld [vmem:[#allocation3] sm:$0x1] }
 0x295   :  { %229 = vlog2.f32 %v162_v51 }
 0x2a2   :  { %v230_v52 = vpop.eup %229 }
 0x2a3   :  { %v164_v53 = vmul.f32 0.6931472, %v230_v52 }
 0x2a5   :  { %v165_v55 = vadd.f32 %v164_v53, %v161_v54 }
 0x2a7   :  { %v180_v57 = vmul.f32 8.0, %v165_v55 }
 0x2a9   :  { %v182_v59 = vsub.f32 %v180_v57, %v181_v56 }
 0x2ab   :  { %v183_v60 = vmul.f32 0.055555556, %v182_v59 }
 0x2ad   :  { %v185_v62 = vadd.f32 %v184_v61, %v183_v60 }
 0x2af   :  { %186 = vst.msk [vmem:[#allocation8] sm:$0x1] %vm36_vm1, %v185_v62 }
 0x2b0   :  { %262 = shalt.err (!%p259_p9)
}
 0x2b1   :  { %196 = dma.vmem_to_hbm [thread:$0]  %s194_s24, 16, %s329_s3, [#allocation7]  }
 0x2b2   :  { %273 = dma.done.wait [#allocation7], 16  }
 0x2b3   :  { %274 = vsyncadd [#allocation7], 4294967280 }
 0x2b4   :  { %200 = vsyncpa [#allocation6], 1 }
 0x2b5   :  { %201 = vsyncpa [#allocation7], 1 }

</bundles_post_ra>
